<compile_context>
chip_gen: v7x
topology: tpu7x:2x2x1
jax: 0.10.0
libtpu: 0.0.40
codegen_flags: <defaults>
</compile_context>

<pallas_src>
import jax
import jax.numpy as jnp
from jax.experimental import pallas as pl
from jax.experimental.pallas import tpu as pltpu

_LANE_COL_CANDIDATES = (1024, 512, 256, 128)   # lane-dense widths (multiples of 128)
_TARGET_BLOCK_BYTES = 4 * 1024 * 1024          # ~4 MiB/block -> 4 buffers ~16 MiB
_VMEM_LIMIT_BYTES = 32 * 1024 * 1024           # explicit, safe on v5e/v6e/v7x
_SPLIT_THRESHOLD_BYTES = 4 * 1024 * 1024       # split >=4 MiB tensors into >=2 tiles


def _rezero_kernel(g_ref, x_ref, o_ref):
    # g_ref: (1,) fp32 scalar in SMEM (scalar prefetch).  Multiply in f32
    # (matches the fp32 nn.Parameter; a no-op cast for f32 inputs) and cast
    # back to the output dtype.
    g = g_ref[0]
    o_ref[...] = (x_ref[...].astype(jnp.float32) * g).astype(o_ref.dtype)


def rezero(x: jax.Array, g: jax.Array) -> jax.Array:
    """Pallas ReZero forward: x * g (g is a scalar fp32 parameter)."""
    orig_shape = x.shape
    dtype = x.dtype
    n = x.size
    if n == 0:
        return x
    itemsize = jnp.dtype(dtype).itemsize

    # ---- choose a zero-copy 2D view (rows, cols) of the flat tensor -------
    cols = None
    for c in _LANE_COL_CANDIDATES:
        if n % c == 0:
            cols = c                    # lane-dense: unmasked full-width stores
            break
    if cols is None:
        # Ragged total size: collapse leading dims, keep the original last dim
        # (full-extent last block dim is always legal).  Stores are masked but
        # there are zero extra HBM copies.
        # TODO(synk): handle ragged tails with an in-kernel masked DMA instead
        # of narrow masked stores for large tensors with awkward shapes.
        cols = orig_shape[-1] if x.ndim >= 2 else n
    rows = n // cols
    x2 = x.reshape(rows, cols)          # contiguous reshape: free (bitcast)

    # ---- row-tile size ------------------------------------------------------
    tr_max = max(8, (_TARGET_BLOCK_BYTES // (cols * itemsize)) // 8 * 8)
    if rows > tr_max:
        tr = tr_max
    elif rows >= 16 and n * itemsize >= _SPLIT_THRESHOLD_BYTES:
        # Mid-size tensor that would otherwise be a single tile: split into
        # ~2 tiles so both v7x TensorCores get work (neutral on v5e/v6e).
        tr = (((rows + 1) // 2) + 7) // 8 * 8
    else:
        tr = rows                       # full-extent row block (always legal)

    # Partial last block is fine: Pallas masks its output stores.
    grid = (pl.cdiv(rows, tr),)

    # Keep g in fp32 to match the PyTorch nn.Parameter precision.
    g1 = g.reshape(1).astype(jnp.float32)

    out = pl.pallas_call(
        _rezero_kernel,
        out_shape=jax.ShapeDtypeStruct((rows, cols), dtype),
        grid_spec=pltpu.PrefetchScalarGridSpec(
            num_scalar_prefetch=1,      # g lands in SMEM before the grid runs
            grid=grid,
            in_specs=[
                pl.BlockSpec((tr, cols), lambda i, g_ref: (i, 0)),
            ],
            out_specs=pl.BlockSpec((tr, cols), lambda i, g_ref: (i, 0)),
        ),
        compiler_params=pltpu.CompilerParams(
            dimension_semantics=("parallel",),
            vmem_limit_bytes=_VMEM_LIMIT_BYTES),
        cost_estimate=pl.CostEstimate(
            flops=n, transcendentals=0, bytes_accessed=2 * n * itemsize),
    )(g1, x2)

    return out.reshape(orig_shape)


if __name__ == "__main__":
    key = jax.random.PRNGKey(0)

    # Module __init__: self.g = nn.Parameter(th.zeros(1))  (fp32)
    g = jnp.zeros((1,), dtype=jnp.float32)

    # Example input consistent with a conv-style NCHW activation.
    x = jax.random.normal(key, (2, 4, 16, 16), dtype=jnp.float32)

    out = jax.block_until_ready(rezero(x, g))
    assert out.shape == x.shape and out.dtype == x.dtype
    assert jnp.allclose(out, jnp.zeros_like(x))

    # Nonzero g check.
    g2 = jnp.full((1,), 0.5, dtype=jnp.float32)
    out2 = jax.block_until_ready(rezero(x, g2))
    assert jnp.allclose(out2, x * 0.5, atol=1e-6)

    # Ragged size (not a multiple of 128): zero-copy fallback, masked stores.
    x3 = jax.random.normal(jax.random.PRNGKey(1), (3, 5, 33, 17),
                           dtype=jnp.float32)
    g3 = jnp.full((1,), -1.25, dtype=jnp.float32)
    out3 = jax.block_until_ready(rezero(x3, g3))
    assert jnp.allclose(out3, x3 * -1.25, atol=1e-6)

    # Mid-size lane-dense tensor (4 MiB): exercises the >=2-tile split path.
    x4 = jax.random.normal(jax.random.PRNGKey(2), (2, 16, 256, 128),
                           dtype=jnp.float32)
    g4 = jnp.full((1,), 2.0, dtype=jnp.float32)
    out4 = jax.block_until_ready(rezero(x4, g4))
    assert jnp.allclose(out4, x4 * 2.0, atol=1e-6)

    print("KERNEL_OK")
</pallas_src>

<mosaic_0001>
module attributes {stable_mosaic.version = 11 : i64} {
  func.func @_rezero_kernel(%arg0: i32, %arg1: memref<1xf32, #tpu.memory_space<smem>>, %arg2: memref<2x1024xf32, #tpu.memory_space<vmem>>, %arg3: memref<2x1024xf32, #tpu.memory_space<vmem>>) attributes {dimension_semantics = [#tpu.dimension_semantics<parallel>], iteration_bounds = array<i64: 1>, scalar_prefetch = 1 : i64, scratch_operands = 0 : i64, tpu.core_type = #tpu.core_type<tc>, window_params = [{transform_indices = @transform_0, window_bounds = array<i64: 2, 1024>}, {transform_indices = @transform_1, window_bounds = array<i64: 2, 1024>}]} {
    %c0 = arith.constant 0 : index
    %0 = memref.load %arg1[%c0] : memref<1xf32, #tpu.memory_space<smem>>
    %c0_0 = arith.constant 0 : index
    %c0_1 = arith.constant 0 : index
    %1 = vector.load %arg2[%c0_0, %c0_1] : memref<2x1024xf32, #tpu.memory_space<vmem>>, vector<2x1024xf32>
    %2 = vector.broadcast %0 : f32 to vector<2x1024xf32>
    %3 = arith.mulf %1, %2 : vector<2x1024xf32>
    %c0_2 = arith.constant 0 : index
    %c0_3 = arith.constant 0 : index
    %4 = vector.load %arg3[%c0_2, %c0_3] : memref<2x1024xf32, #tpu.memory_space<vmem>>, vector<2x1024xf32>
    tpu.vector_store %arg3[%c0_2, %c0_3], %3 {strides = array<i32>} : memref<2x1024xf32, #tpu.memory_space<vmem>>, vector<2x1024xf32>,
    return
  }
  func.func @transform_0(%arg0: i32, %arg1: memref<1xf32, #tpu.memory_space<smem>>) -> (i32, i32) {
    %c0_i32 = arith.constant 0 : i32
    %c0_i32_0 = arith.constant 0 : i32
    return %arg0, %c0_i32 : i32, i32
  }
  func.func @transform_1(%arg0: i32, %arg1: memref<1xf32, #tpu.memory_space<smem>>) -> (i32, i32) {
    %c0_i32 = arith.constant 0 : i32
    %c0_i32_0 = arith.constant 0 : i32
    return %arg0, %c0_i32 : i32, i32
  }
}

</mosaic_0001>

<bundles_post_ra>
// kernel: tpu_custom_call.1
= control target key start
LH: loop header
LB: loop body
LE: loop exit
PB: predicated region body
PF: predicated region fallthrough
CT: control target
= control target key end

     0   :  { %8 = vsyncpa [#allocation5], 0  ;;  %s140_s0 = inlined_call_operand.<no memory space> [shape: f32[1], index: 0, kind: input, shape index: {}]   ;;  %s141_s1 = inlined_call_operand.hbm [shape: f32[2,1024], index: 1, kind: input, shape index: {}]   ;;  %s142_s2 = inlined_call_operand.hbm [shape: f32[2,1024], index: 2, kind: output, shape index: {}]  }
   0x1   :  { %9 = vsyncpa [#allocation6], 0  ;;  %s96_s9 = smov [#allocation4]   ;;  %s48_s13 = scalar_lea.hbm %s141_s1, 256 }
   0x2   :  { %s16_s10 = sshll.u32 %s96_s9, 4  ;;  %p49_p0 = scmp.ne.s32.totalorder %s141_s1, %s48_s13  ;;  %s17_s10 = int_to_ptr.vmem [resolvable:$true] %s16_s10 }
   0x3   :  { %p52_p1 = scmp.lt.u32.totalorder %s48_s13, %s141_s1 }
   0x5   :  { %p54_p2 = pnand %p52_p1, %p49_p0 }
   0x7   :  { %57 = shalt.err (!%p54_p2)
}
   0x8   :  { %s58_s18 = scalar_lea.vmem %s17_s10, 256  ;;  %p63_p4 = scmp.lt.s32.totalorder %s17_s10, %s17_s10 }
   0x9   :  { %p59_p3 = scmp.ne.s32.totalorder %s17_s10, %s58_s18  ;;  %p64_p5 = scmp.lt.s32.totalorder %s58_s18, %s58_s18 }
   0xb   :  { %p65_p6 = por %p64_p5, %p63_p4 }
   0xd   :  { %p66_p7 = pnand %p65_p6, %p59_p3 }
   0xf   :  { %69 = shalt.err (!%p66_p7)
}
  0x10   :  { %19 = dma.hbm_to_vmem [thread:$0]  %s141_s1, 256, %s17_s10, [#allocation5]  }
  0x11   :  { %92 = dma.done.wait [#allocation5], 256  }
  0x12   :  { %93 = vsyncadd [#allocation5], 4294967040  ;;  %v26_v0 = vstv %s140_s0  ;;  %s97_s23 = smov [#allocation7]   ;;  %v24_v1 = vld [vmem:[#allocation4] sm:$0xff]  ;;  %v25_v2 = vld [vmem:[#allocation4 + $0x8] sm:$0xff] }
  0x13   :  { %s37_s24 = sshll.u32 %s97_s23, 4  ;;  %v27_v3 = vmul.f32 %v26_v0, %v24_v1  ;;  %v28_v4 = vmul.f32 %v26_v0, %v25_v2  ;;  %s38_s24 = int_to_ptr.vmem [resolvable:$true] %s37_s24 }
  0x14   :  { %s70_s25 = scalar_lea.vmem %s38_s24, 256  ;;  %p75_p9 = scmp.lt.s32.totalorder %s38_s24, %s38_s24 }
  0x15   :  { %29 = vst [vmem:[#allocation7] sm:$0xff] %v27_v3  ;;  %30 = vst [vmem:[#allocation7 + $0x8] sm:$0xff] %v28_v4  ;;  %p71_p8 = scmp.ne.s32.totalorder %s38_s24, %s70_s25  ;;  %p76_p10 = scmp.lt.s32.totalorder %s70_s25, %s70_s25 }
  0x17   :  { %p77_p11 = por %p76_p10, %p75_p9 }
  0x19   :  { %p78_p12 = pnand %p77_p11, %p71_p8 }
  0x1b   :  { %81 = shalt.err (!%p78_p12)
}
  0x1c   :  { %s82_s0 = scalar_lea.hbm %s142_s2, 256 }
  0x1d   :  { %p83_p13 = scmp.ne.s32.totalorder %s142_s2, %s82_s0  ;;  %p86_p0 = scmp.lt.u32.totalorder %s82_s0, %s142_s2 }
  0x1f   :  { %p88_p1 = pnand %p86_p0, %p83_p13 }
  0x21   :  { %91 = shalt.err (!%p88_p1)
}
  0x22   :  { %40 = dma.vmem_to_hbm [thread:$0]  %s38_s24, 256, %s142_s2, [#allocation6]  }
  0x23   :  { %94 = dma.done.wait [#allocation6], 256  }
  0x24   :  { %95 = vsyncadd [#allocation6], 4294967040 }
  0x25   :  { %44 = vsyncpa [#allocation5], 1 }
  0x26   :  { %45 = vsyncpa [#allocation6], 1 }

</bundles_post_ra>
